<compile_context>
chip_gen: v6e
topology: v6e:2x2x1
jax: 0.10.0
libtpu: 0.0.40
codegen_flags: <defaults>
</compile_context>

<pallas_src>
import numpy as np
import jax
import jax.numpy as jnp
from jax.experimental import pallas as pl
from jax.experimental.pallas import tpu as pltpu


# ----------------------------- module config ------------------------------ #
INPUT_DIM = 4
N_FREQS = 4
MAX_FREQ_LOG2 = 3.0
LOG_SAMPLING = True
INCLUDE_INPUT = True
N_ANNEAL = 100000
N_ANNEAL_MIN_FREQ = 0
USE_ANNEALING = True

FD = INPUT_DIM * N_FREQS                                   # rows per periodic fn
OUT_DIM = (INPUT_DIM if INCLUDE_INPUT else 0) + 2 * FD      # 36


# --------------------------- host-side constants --------------------------- #
def _freq_bands():
    if LOG_SAMPLING:
        bands = 2.0 ** np.linspace(0.0, MAX_FREQ_LOG2, N_FREQS)
    else:
        bands = np.linspace(2.0 ** 0.0, 2.0 ** MAX_FREQ_LOG2, N_FREQS)
    return [float(b) for b in bands]


FREQ_BANDS = _freq_bands()


def anneal_weights(iteration):
    """Per-band anneal weights.  Computed with jnp so `iteration` may be a
    traced scalar: the schedule stays live under jit and distinct iteration
    values do NOT trigger new Mosaic compiles."""
    if not USE_ANNEALING:
        return jnp.ones((N_FREQS,), jnp.float32)
    it = jnp.asarray(iteration, jnp.float32)
    alpha = (N_FREQS - N_ANNEAL_MIN_FREQ) * it / N_ANNEAL
    i = jnp.arange(N_FREQS, dtype=jnp.float32)
    return (1.0 - jnp.cos(jnp.pi * jnp.clip(alpha - i + N_ANNEAL_MIN_FREQ, 0.0, 1.0))) * 0.5


def _row_perm():
    """kernel-row index for each reference row: ref_order = kernel_rows[ROW_PERM]."""
    perm = []
    if INCLUDE_INPUT:
        perm += list(range(2 * FD, 2 * FD + INPUT_DIM))
    for i in range(N_FREQS):
        perm += list(range(i * INPUT_DIM, (i + 1) * INPUT_DIM))            # sin_i
        perm += list(range(FD + i * INPUT_DIM, FD + (i + 1) * INPUT_DIM))  # cos_i
    return np.asarray(perm, dtype=np.int32)


ROW_PERM = _row_perm()


# --------------------------------- kernel ---------------------------------- #
def _embedder_kernel(w_ref, x_ref, o_ref):
    """w_ref: SMEM (N_FREQS,) f32 anneal weights (scalar-prefetched).
       x_ref: VMEM (INPUT_DIM, TN) f32, lane-dense (points on lanes).
       o_ref: VMEM (OUT_DIM, TN); rows = [sin(all bands) | cos(all bands) | input]."""
    x = x_ref[...]
    # Pack all frequency bands into full 8-sublane vregs: one sin and one cos
    # stream over a (FD, TN) tile instead of 2*N_FREQS half-occupied (4, TN)
    # tiles.  Halves EUP/VPU pushes (matters on v7x / with bf16 output).
    xf = jnp.concatenate([x * f for f in FREQ_BANDS], axis=0)            # (FD, TN)
    # Anneal weights: 4 SMEM scalar loads per block, expanded to a per-row
    # column and broadcast-multiplied across lanes.
    w_col = jnp.concatenate(
        [jnp.full((INPUT_DIM, 1), w_ref[i], dtype=jnp.float32)
         for i in range(N_FREQS)], axis=0)                               # (FD, 1)
    dt = o_ref.dtype
    # 8-sublane-aligned, full-width stores (rows 0:FD and FD:2*FD).
    o_ref[0:FD, :] = (jnp.sin(xf) * w_col).astype(dt)
    o_ref[FD:2 * FD, :] = (jnp.cos(xf) * w_col).astype(dt)
    if INCLUDE_INPUT:
        o_ref[2 * FD:2 * FD + INPUT_DIM, :] = x.astype(dt)


# -------------------------------- wrappers ---------------------------------- #
def _round_up(x, m):
    return ((x + m - 1) // m) * m


def _pick_tiling(n, tile_n, out_itemsize):
    # Keep f32-output tiles smaller so double-buffered blocks + sin/cos
    # temporaries stay well inside the scoped-VMEM limit on every generation
    # (v7x has only 64 MiB/TC physical VMEM).
    if out_itemsize >= 4:
        tile_n = min(tile_n, 32768)
    # v7x megacore: aim for >=4 grid steps when there is enough data so the
    # "parallel" axis can feed both TensorCores (no cost on 1-TC v5e/v6e).
    nb = max(pl.cdiv(n, tile_n), min(4, pl.cdiv(n, 128)), 1)
    # Adaptive tile: bounds padding waste instead of rounding n to a full tile.
    tn = _round_up(pl.cdiv(n, nb), 128)
    nb = pl.cdiv(n, tn)
    return tn, nb


def embedder_lane_dense(x_t, weights, *, tile_n=65536, out_dtype=jnp.bfloat16):
    """Production entry point (no relayout).

    x_t:     lane-dense (INPUT_DIM, N) slab (points on the last axis).
    weights: anneal_weights(iteration), shape (N_FREQS,) float32 (may be traced).

    Returns an (OUT_DIM, N_padded) slab in *kernel row order*:
        rows [0, FD)          : sin(x * f_i) * w_i   (i = 0..N_FREQS-1)
        rows [FD, 2*FD)       : cos(x * f_i) * w_i
        rows [2*FD, OUT_DIM)  : raw input (if INCLUDE_INPUT)
    Reference (PyTorch) row order is kernel_rows[ROW_PERM].  A fused consumer
    (the NeRF MLP's first matmul contracts over OUT_DIM) should permute its
    weight-matrix rows by ROW_PERM (free) and consume this slab directly —
    no output transpose, no extra HBM pass.
    """
    assert x_t.shape[0] == INPUT_DIM
    assert weights.shape == (N_FREQS,)
    n = x_t.shape[1]
    out_itemsize = jnp.dtype(out_dtype).itemsize
    tn, nb = _pick_tiling(n, tile_n, out_itemsize)
    n_padded = nb * tn
    if n_padded != n:
        x_t = jnp.pad(x_t, ((0, 0), (0, n_padded - n)))

    cost = pl.CostEstimate(
        flops=3 * FD * n_padded,
        transcendentals=2 * FD * n_padded,
        bytes_accessed=n_padded * (INPUT_DIM * 4 + OUT_DIM * out_itemsize),
    )

    return pl.pallas_call(
        _embedder_kernel,
        out_shape=jax.ShapeDtypeStruct((OUT_DIM, n_padded), out_dtype),
        grid_spec=pltpu.PrefetchScalarGridSpec(
            num_scalar_prefetch=1,
            grid=(nb,),
            in_specs=[pl.BlockSpec((INPUT_DIM, tn), lambda i, w: (0, i))],
            out_specs=pl.BlockSpec((OUT_DIM, tn), lambda i, w: (0, i)),
        ),
        compiler_params=pltpu.CompilerParams(
            dimension_semantics=("parallel",),
            vmem_limit_bytes=48 * 1024 * 1024,
        ),
        cost_estimate=cost,
    )(weights.astype(jnp.float32), x_t.astype(jnp.float32))


def embedder_forward(x, iteration, *, tile_n=65536, out_dtype=jnp.float32):
    """Reference-compatible wrapper: [..., INPUT_DIM] -> [..., OUT_DIM], exactly
    the PyTorch module's layout/semantics.  NOTE: the final permute/transpose is
    kept only for byte-compatibility; it roughly triples end-to-end HBM traffic.
    A fused consumer should call embedder_lane_dense() instead and skip it."""
    assert x.shape[-1] == INPUT_DIM
    lead = x.shape[:-1]
    n = int(np.prod(lead)) if lead else 1
    # TODO(synk): produce/store the point cloud as (INPUT_DIM, N) upstream to
    # avoid this 4-wide-minor input transpose as well.
    x_t = x.reshape(n, INPUT_DIM).T
    out_t = embedder_lane_dense(x_t, anneal_weights(iteration),
                                tile_n=tile_n, out_dtype=out_dtype)
    out = out_t[ROW_PERM, :n].T
    return out.reshape(*lead, OUT_DIM)


# ------------------------------ reference ---------------------------------- #
def embedder_reference(x, iteration):
    x = np.asarray(x, dtype=np.float32)
    alpha = (N_FREQS - N_ANNEAL_MIN_FREQ) * float(iteration) / N_ANNEAL
    parts = [x] if INCLUDE_INPUT else []
    for i in range(N_FREQS):
        w = (1.0 - np.cos(np.pi * np.clip(alpha - i + N_ANNEAL_MIN_FREQ, 0.0, 1.0))) / 2.0
        if not USE_ANNEALING:
            w = 1.0
        xf = x * FREQ_BANDS[i]
        parts.append(np.sin(xf) * w)
        parts.append(np.cos(xf) * w)
    return np.concatenate(parts, axis=-1)


# --------------------------------- main ------------------------------------ #
if __name__ == "__main__":
    key = jax.random.PRNGKey(0)
    # Small shape consistent with the module: [..., input_dim] = [2, 8, 4]
    x = jax.random.normal(key, (2, 8, INPUT_DIM), dtype=jnp.float32)
    iteration = 50000  # mid-anneal: weights = [1, 1, 0, 0]

    ref = embedder_reference(np.asarray(x), iteration)

    # 1) Reference-compatible path (f32, [..., OUT_DIM]) — tight tolerance.
    y = jax.block_until_ready(embedder_forward(x, iteration, out_dtype=jnp.float32))
    assert y.shape == (2, 8, OUT_DIM), y.shape
    np.testing.assert_allclose(np.asarray(y), ref, rtol=1e-5, atol=1e-5)

    # 2) Same path under jit with a *traced* iteration (no per-step recompile
    #    since the anneal weights are an SMEM input, not baked constants).
    jit_fwd = jax.jit(lambda xx, it: embedder_forward(xx, it, out_dtype=jnp.float32))
    y_jit = jax.block_until_ready(jit_fwd(x, jnp.int32(iteration)))
    np.testing.assert_allclose(np.asarray(y_jit), ref, rtol=1e-5, atol=1e-5)

    # 3) Production lane-dense path (bf16 slab, no device-side transpose);
    #    the relayout below is host-side numpy purely for the check.
    n = 2 * 8
    x_t = jnp.asarray(np.asarray(x).reshape(n, INPUT_DIM).T)
    y_ld = jax.block_until_ready(embedder_lane_dense(x_t, anneal_weights(iteration)))
    y_ld_np = np.asarray(y_ld, dtype=np.float32)[ROW_PERM][:, :n].T.reshape(2, 8, OUT_DIM)
    np.testing.assert_allclose(y_ld_np, ref, rtol=2e-2, atol=2e-2)

    print("KERNEL_OK")
</pallas_src>

<mosaic_0001>
module attributes {stable_mosaic.version = 11 : i64} {
  func.func @_embedder_kernel(%arg0: i32, %arg1: memref<4xf32, #tpu.memory_space<smem>>, %arg2: memref<4x128xf32, #tpu.memory_space<vmem>>, %arg3: memref<36x128xf32, #tpu.memory_space<vmem>>) attributes {dimension_semantics = [#tpu.dimension_semantics<parallel>], iteration_bounds = array<i64: 1>, scalar_prefetch = 1 : i64, scratch_operands = 0 : i64, tpu.core_type = #tpu.core_type<tc>, window_params = [{transform_indices = @transform_0, window_bounds = array<i64: 4, 128>}, {transform_indices = @transform_1, window_bounds = array<i64: 36, 128>}]} {
    %c0 = arith.constant 0 : index
    %c0_0 = arith.constant 0 : index
    %0 = vector.load %arg2[%c0, %c0_0] : memref<4x128xf32, #tpu.memory_space<vmem>>, vector<4x128xf32>
    %cst = arith.constant 1.000000e+00 : f32
    %1 = vector.broadcast %cst : f32 to vector<4x128xf32>
    %2 = arith.mulf %0, %1 : vector<4x128xf32>
    %cst_1 = arith.constant 2.000000e+00 : f32
    %3 = vector.broadcast %cst_1 : f32 to vector<4x128xf32>
    %4 = arith.mulf %0, %3 : vector<4x128xf32>
    %cst_2 = arith.constant 4.000000e+00 : f32
    %5 = vector.broadcast %cst_2 : f32 to vector<4x128xf32>
    %6 = arith.mulf %0, %5 : vector<4x128xf32>
    %cst_3 = arith.constant 8.000000e+00 : f32
    %7 = vector.broadcast %cst_3 : f32 to vector<4x128xf32>
    %8 = arith.mulf %0, %7 : vector<4x128xf32>
    %9 = tpu.concatenate %2, %4, %6, %8 in 0 : vector<4x128xf32>, vector<4x128xf32>, vector<4x128xf32>, vector<4x128xf32> -> vector<16x128xf32>
    %c0_4 = arith.constant 0 : index
    %10 = memref.load %arg1[%c0_4] : memref<4xf32, #tpu.memory_space<smem>>
    %11 = vector.broadcast %10 : f32 to vector<4x1xf32>
    %c1 = arith.constant 1 : index
    %12 = memref.load %arg1[%c1] : memref<4xf32, #tpu.memory_space<smem>>
    %13 = vector.broadcast %12 : f32 to vector<4x1xf32>
    %c2 = arith.constant 2 : index
    %14 = memref.load %arg1[%c2] : memref<4xf32, #tpu.memory_space<smem>>
    %15 = vector.broadcast %14 : f32 to vector<4x1xf32>
    %c3 = arith.constant 3 : index
    %16 = memref.load %arg1[%c3] : memref<4xf32, #tpu.memory_space<smem>>
    %17 = vector.broadcast %16 : f32 to vector<4x1xf32>
    %18 = tpu.concatenate %11, %13, %15, %17 in 0 : vector<4x1xf32>, vector<4x1xf32>, vector<4x1xf32>, vector<4x1xf32> -> vector<16x1xf32>
    %19 = math.sin %9 : vector<16x128xf32>
    %20 = vector.broadcast %18 : vector<16x1xf32> to vector<16x128xf32>
    %21 = arith.mulf %19, %20 : vector<16x128xf32>
    %c0_5 = arith.constant 0 : index
    %c0_6 = arith.constant 0 : index
    %22 = vector.load %arg3[%c0_5, %c0_6] : memref<36x128xf32, #tpu.memory_space<vmem>>, vector<16x128xf32>
    tpu.vector_store %arg3[%c0_5, %c0_6], %21 {strides = array<i32>} : memref<36x128xf32, #tpu.memory_space<vmem>>, vector<16x128xf32>,
    %23 = math.cos %9 : vector<16x128xf32>
    %24 = vector.broadcast %18 : vector<16x1xf32> to vector<16x128xf32>
    %25 = arith.mulf %23, %24 : vector<16x128xf32>
    %c16 = arith.constant 16 : index
    %c0_7 = arith.constant 0 : index
    %26 = vector.load %arg3[%c16, %c0_7] : memref<36x128xf32, #tpu.memory_space<vmem>>, vector<16x128xf32>
    tpu.vector_store %arg3[%c16, %c0_7], %25 {strides = array<i32>} : memref<36x128xf32, #tpu.memory_space<vmem>>, vector<16x128xf32>,
    %c32 = arith.constant 32 : index
    %c0_8 = arith.constant 0 : index
    %27 = vector.load %arg3[%c32, %c0_8] : memref<36x128xf32, #tpu.memory_space<vmem>>, vector<4x128xf32>
    tpu.vector_store %arg3[%c32, %c0_8], %0 {strides = array<i32>} : memref<36x128xf32, #tpu.memory_space<vmem>>, vector<4x128xf32>,
    return
  }
  func.func @transform_0(%arg0: i32, %arg1: memref<4xf32, #tpu.memory_space<smem>>) -> (i32, i32) {
    %c0_i32 = arith.constant 0 : i32
    %c0_i32_0 = arith.constant 0 : i32
    return %c0_i32, %arg0 : i32, i32
  }
  func.func @transform_1(%arg0: i32, %arg1: memref<4xf32, #tpu.memory_space<smem>>) -> (i32, i32) {
    %c0_i32 = arith.constant 0 : i32
    %c0_i32_0 = arith.constant 0 : i32
    return %c0_i32, %arg0 : i32, i32
  }
}

</mosaic_0001>

<bundles_post_ra>
// kernel: tpu_custom_call.1
= control target key start
LH: loop header
LB: loop body
LE: loop exit
PB: predicated region body
PF: predicated region fallthrough
CT: control target
= control target key end

     0   :  { %s601_s9 = smov [#allocation3]   ;;  %s703_s0 = inlined_call_operand.hbm [shape: f32[4], index: 0, kind: input, shape index: {}]   ;;  %s704_s1 = inlined_call_operand.hbm [shape: f32[4,128], index: 1, kind: input, shape index: {}]   ;;  %s705_s2 = inlined_call_operand.hbm [shape: f32[36,128], index: 2, kind: output, shape index: {}]  }
   0x1   :  { %8 = dma.hbm_to_smem %s703_s0, 16, %s601_s9, [#allocation2] }
   0x2   :  { %595 = dma.done.wait [#allocation2], 16 }
   0x3   :  { %596 = vsyncadd [#allocation2], 4294967280 }
   0x4   :  { %10 = sfence }
   0x5   :  { %11 = vsyncpa [#allocation5], 0 }
   0x6   :  { %12 = vsyncpa [#allocation6], 0  ;;  %s602_s12 = smov [#allocation4]  }
   0x7   :  { %s19_s13 = sshll.u32 %s602_s12, 4  ;;  %s20_s13 = int_to_ptr.vmem [resolvable:$true] %s19_s13 }
   0x8   :  { %s563_s14 = scalar_lea.vmem %s20_s13, 64  ;;  %p568_p1 = scmp.lt.s32.totalorder %s20_s13, %s20_s13 }
   0x9   :  { %p564_p0 = scmp.ne.s32.totalorder %s20_s13, %s563_s14  ;;  %p569_p2 = scmp.lt.s32.totalorder %s563_s14, %s563_s14 }
   0xb   :  { %p570_p3 = por %p569_p2, %p568_p1 }
   0xd   :  { %p571_p4 = pnand %p570_p3, %p564_p0 }
   0xf   :  { %574 = shalt.err (!%p571_p4)
}
  0x10   :  { %22 = dma.hbm_to_vmem [thread:$0]  %s704_s1, 64, %s20_s13, [#allocation5]  }
  0x11   :  { %597 = dma.done.wait [#allocation5], 64  }
  0x12   :  { %598 = vsyncadd [#allocation5], 4294967232  ;;  %v603_v0 = vmov 0   ;;  %s39_s0 = sld [smem:[#allocation3]]  ;;  %vm36_vm0 = vcmask 1043456   ;;  %s610_s1 = smov [#allocation7]  }
  0x13   :  { %538 = vset.pattern.permute.xlu0 %v603_v0  ;;  %s499_s17 = sld [smem:[#allocation3 + $0x1]]  ;;  %v26_v2 = vld [vmem:[#allocation4] sm:$0xf]  ;;  %v604_v36 = vmov 2102212464   ;;  %s487_s20 = sshll.u32 %s610_s1, 4  ;;  %s488_s20 = int_to_ptr.vmem [resolvable:$true] %s487_s20 }
  0x14   :  { %s500_s18 = sld [smem:[#allocation3 + $0x2]]  ;;  %v27_v4 = vmul.f32 2.0, %v26_v2  ;;  %v28_v5 = vmul.f32 4.0, %v26_v2  ;;  %v29_v6 = vmul.f32 8.0, %v26_v2  ;;  %481 = vst [vmem:[#allocation7 + $0x20] sm:$0xf] %v26_v2  ;;  %p580_p6 = scmp.lt.s32.totalorder %s488_s20, %s488_s20 }
  0x15   :  { %s501_s19 = sld [smem:[#allocation3 + $0x3]]  ;;  %v605_v38 = vmov 920167782   ;;  %v606_v45 = vmov 1326507024   ;;  %s575_s21 = scalar_lea.vmem %s488_s20, 640 }
  0x16   :  { %v31_v9 = vrot.slane %v27_v4, 4  ;;  %v34_v10 = vrot.slane %v29_v6, 4  ;;  %v607_v47 = vmov 683565275   ;;  %v608_v52 = vmov 2475754826   ;;  %p576_p5 = scmp.ne.s32.totalorder %s488_s20, %s575_s21  ;;  %p581_p7 = scmp.lt.s32.totalorder %s575_s21, %s575_s21 }
  0x17   :  { %v609_v57 = vmov 2131351028  }
  0x18   :  { %v40_v1 = vstv %s39_s0  ;;  %v637_v13 = vsel %vm36_vm0, %v26_v2, %v31_v9  ;;  %v640_v14 = vsel %vm36_vm0, %v28_v5, %v34_v10  ;;  %p582_p8 = por %p581_p7, %p580_p6 }
  0x19   :  { %v42_v3 = vstv %s499_s17  ;;  %v52_v15 = vand.u32 2139095040, %v637_v13  ;;  %v156_v16 = vand.u32 2139095040, %v640_v14  ;;  %v49_v17 = vand.u32 2147483647, %v637_v13 }
  0x1a   :  { %v47_v7 = vsel %vm36_vm0, %v40_v1, %v42_v3  ;;  %v44_v8 = vstv %s500_s18  ;;  %v153_v21 = vand.u32 2147483647, %v640_v14  ;;  %vm51_vm15 = vcmp.lt.s32.totalorder %v637_v13, 0  ;;  %p583_p9 = pnand %p582_p8, %p576_p5 }
  0x1b   :  { %259 = vperm.xlu0 %538, %v47_v7   ;;  %v46_v11 = vstv %s501_s19  ;;  %v53_v18 = vshrl.u32 %v52_v15, 23  ;;  %v157_v19 = vshrl.u32 %v156_v16, 23  ;;  %v56_v20 = vand.u32 8388607, %v49_v17 }
  0x1c   :  { %v48_v12 = vsel %vm36_vm0, %v44_v8, %v46_v11  ;;  %v160_v27 = vand.u32 8388607, %v153_v21  ;;  %vm50_vm0 = vcmp.le.f32.partialorder %v49_v17, 0.7853982 }
  0x1d   :  { %v502_v22 = vadd.s32 4294967169, %v53_v18  ;;  %v506_v23 = vadd.s32 4294967169, %v157_v19  ;;  %v57_v26 = vor.u32 8388608, %v56_v20 }
  0x1e   :  { %v161_v34 = vor.u32 8388608, %v160_v27 }
  0x1f   :  { %264 = vperm.xlu0 %538, %v48_v12   ;;  %v59_v24 = vadd.s32 1, %v502_v22  ;;  %v163_v25 = vadd.s32 1, %v506_v23  ;;  %v650_v33 = vshll.u32 %v57_v26, 8 }
  0x20   :  { %v201_v4 = vshll.u32 %v161_v34, 8 }
  0x21   :  { %vm60_vm1 = vcmp.gt.s32.totalorder %v59_v24, 0  ;;  %vm164_vm2 = vcmp.gt.s32.totalorder %v163_v25, 0 }
  0x22   :  { %v61_v28 = vsel %vm60_vm1, %v59_v24, 0  ;;  %v165_v29 = vsel %vm164_vm2, %v163_v25, 0  ;;  %vm155_vm1 = vcmp.lt.s32.totalorder %v640_v14, 0  ;;  %vm154_vm2 = vcmp.le.f32.partialorder %v153_v21, 0.7853982 }
  0x23   :  { %v62_v30 = vshrl.u32 %v61_v28, 5  ;;  %v63_v31 = vand.u32 31, %v61_v28  ;;  %v167_v32 = vand.u32 31, %v165_v29  ;;  %v652_v40 = vshrl.u32 %v165_v29, 5 }
  0x25   :  { %v64_v35 = vsub.s32 32, %v63_v31  ;;  %v75_v37 = vshll.u32 %v604_v36, %v63_v31  ;;  %v78_v39 = vshll.u32 %v605_v38, %v63_v31  ;;  %vm84_vm3 = vcmp.lt.s32.totalorder %v62_v30, 4 }
  0x26   :  { %v168_v41 = vsub.s32 32, %v167_v32  ;;  %v179_v42 = vshll.u32 %v604_v36, %v167_v32  ;;  %v182_v43 = vshll.u32 %v605_v38, %v167_v32  ;;  %v66_v49 = vshll.u32 %v607_v47, %v63_v31 }
  0x27   :  { %v76_v44 = vshrl.u32 %v605_v38, %v64_v35  ;;  %v79_v46 = vshrl.u32 %v606_v45, %v64_v35  ;;  %v65_v48 = vshrl.u32 %v607_v47, %v64_v35  ;;  %v67_v53 = vshrl.u32 %v608_v52, %v64_v35 }
  0x28   :  { %v180_v50 = vshrl.u32 %v605_v38, %v168_v41  ;;  %v183_v51 = vshrl.u32 %v606_v45, %v168_v41  ;;  %v69_v54 = vshll.u32 %v608_v52, %v63_v31  ;;  %v70_v58 = vshrl.u32 %v609_v57, %v64_v35 }
  0x29   :  { %v77_v55 = vor.u32 %v76_v44, %v75_v37  ;;  %v80_v56 = vor.u32 %v79_v46, %v78_v39  ;;  %v72_v59 = vshll.u32 %v609_v57, %v63_v31  ;;  %vm188_vm4 = vcmp.lt.s32.totalorder %v652_v40, 4 }
  0x2a   :  { %v184_v60 = vor.u32 %v183_v51, %v182_v43  ;;  %v68_v61 = vor.u32 %v67_v53, %v66_v49  ;;  %v73_v62 = vshrl.u32 %v604_v36, %v64_v35  ;;  %v71_v1 = vor.u32 %v70_v58, %v69_v54 }
  0x2b   :  { %v90_v63 = vsel %vm84_vm3, %v77_v55, 920167782  ;;  %v94_v0 = vsel %vm84_vm3, %v80_v56, 1326507024  ;;  %vm81_vm5 = vcmp.lt.s32.totalorder %v62_v30, 1  ;;  %v181_v2 = vor.u32 %v180_v50, %v179_v42 }
  0x2c   :  { %v74_v3 = vor.u32 %v73_v62, %v72_v59  ;;  %vm82_vm6 = vcmp.lt.s32.totalorder %v62_v30, 2  ;;  %v198_v5 = vsel %vm188_vm4, %v184_v60, 1326507024  ;;  %vm83_vm7 = vcmp.lt.s32.totalorder %v62_v30, 3 }
  0x2d   :  { %v85_v6 = vsel %vm81_vm5, %v65_v48, %v68_v61  ;;  %v89_v7 = vsel %vm81_vm5, %v68_v61, %v71_v1  ;;  %v95_v11 = vsel %vm83_vm7, %v77_v55, %v94_v0  ;;  %v170_v18 = vshll.u32 %v607_v47, %v167_v32 }
  0x2e   :  { %v86_v8 = vsel %vm84_vm3, %v74_v3, 2102212464  ;;  %v91_v9 = vsel %vm83_vm7, %v74_v3, %v90_v63  ;;  %v93_v10 = vsel %vm81_vm5, %v71_v1, %v74_v3  ;;  %v171_v23 = vshrl.u32 %v608_v52, %v168_v41 }
  0x2f   :  { %v87_v12 = vsel %vm83_vm7, %v71_v1, %v86_v8  ;;  %v92_v15 = vsel %vm82_vm6, %v89_v7, %v91_v9  ;;  %v96_v16 = vsel %vm82_vm6, %v93_v10, %v95_v11  ;;  %v169_v26 = vshrl.u32 %v607_v47, %v168_v41 }
  0x30   :  { %v88_v19 = vsel %vm82_vm6, %v85_v6, %v87_v12  ;;  %v661_v20 = vmul.u32.u64.low %v650_v33, %v96_v16  ;;  %v662_v22 = vmul.u32.u64.high %v650_v33, %v96_v16, %v661_v20  ;;  %v173_v27 = vshll.u32 %v608_v52, %v167_v32 }
  0x31   :  { %v665_v24 = vmul.u32.u64.low %v650_v33, %v92_v15  ;;  %v666_v25 = vmul.u32.u64.high %v650_v33, %v92_v15, %v665_v24  ;;  %v172_v28 = vor.u32 %v171_v23, %v170_v18  ;;  %v174_v29 = vshrl.u32 %v609_v57, %v168_v41 }
  0x32   :  { %v176_v30 = vshll.u32 %v609_v57, %v167_v32  ;;  %v177_v31 = vshrl.u32 %v604_v36, %v168_v41  ;;  %v194_v34 = vsel %vm188_vm4, %v181_v2, 920167782  ;;  %v104_v35 = vmul.u32 %v650_v33, %v88_v19 }
  0x33   :  { %vm185_vm8 = vcmp.lt.s32.totalorder %v652_v40, 1  ;;  %vm187_vm9 = vcmp.lt.s32.totalorder %v652_v40, 3  ;;  %vm106_vm10 = vc.u32 %v662_v22, %v665_v24  ;;  %v175_v37 = vor.u32 %v174_v29, %v173_v27 }
  0x34   :  { %v178_v38 = vor.u32 %v177_v31, %v176_v30  ;;  %vm186_vm11 = vcmp.lt.s32.totalorder %v652_v40, 2  ;;  %v107_v39 = vadd.s32 1, %v666_v25  ;;  %v189_v42 = vsel %vm185_vm8, %v169_v26, %v172_v28 }
  0x35   :  { %v199_v32 = vsel %vm187_vm9, %v181_v2, %v198_v5  ;;  %v193_v41 = vsel %vm185_vm8, %v172_v28, %v175_v37  ;;  %v105_v12 = vadd.s32 %v665_v24, %v662_v22 }
  0x36   :  { %v190_v36 = vsel %vm188_vm4, %v178_v38, 2102212464  ;;  %v195_v43 = vsel %vm187_vm9, %v178_v38, %v194_v34  ;;  %v197_v33 = vsel %vm185_vm8, %v175_v37, %v178_v38  ;;  %v108_v44 = vsel %vm106_vm10, %v107_v39, %v666_v25 }
  0x37   :  { %v191_v45 = vsel %vm187_vm9, %v175_v37, %v190_v36  ;;  %v196_v46 = vsel %vm186_vm11, %v193_v41, %v195_v43  ;;  %v200_v47 = vsel %vm186_vm11, %v197_v33, %v199_v32  ;;  %v109_v48 = vadd.s32 %v108_v44, %v104_v35 }
  0x38   :  { %v679_v49 = vmul.u32.u64.low %v201_v4, %v200_v47  ;;  %v680_v50 = vmul.u32.u64.high %v201_v4, %v200_v47, %v679_v49  ;;  %v192_v51 = vsel %vm186_vm11, %v189_v42, %v191_v45 }
  0x39   :  { %v682_v52 = vmul.u32.u64.low %v201_v4, %v196_v46  ;;  %v683_v53 = vmul.u32.u64.high %v201_v4, %v196_v46, %v682_v52  ;;  %v110_v54 = vadd.s32 536870912, %v109_v48  ;;  %v208_v40 = vmul.u32 %v201_v4, %v192_v51 }
  0x3b   :  { %v111_v55 = vshrl.u32 %v110_v54, 30  ;;  %vm210_vm12 = vc.u32 %v680_v50, %v682_v52  ;;  %v211_v56 = vadd.s32 1, %v683_v53  ;;  %v209_v25 = vadd.s32 %v682_v52, %v680_v50 }
  0x3d   :  { %v112_v57 = vshll.u32 %v111_v55, 30  ;;  %v212_v58 = vsel %vm210_vm12, %v211_v56, %v683_v53  ;;  %v135_v45 = vsub.s32 4, %v111_v55 }
  0x3e   :  { %v213_v60 = vadd.s32 %v212_v58, %v208_v40 }
  0x3f   :  { %v113_v59 = vsub.s32 %v109_v48, %v112_v57  ;;  %v136_v47 = vsel %vm51_vm15, %v135_v45, %v111_v55 }
  0x40   :  { %v214_v62 = vadd.s32 536870912, %v213_v60  ;;  %v138_v17 = vsel %vm50_vm0, 0, %v136_v47 }
  0x41   :  { %v115_v61 = vsub.s32 0, %v113_v59  ;;  %v142_v50 = vadd.s32 3, %v138_v17  ;;  %v364_v54 = vand.u32 3, %v138_v17 }
  0x42   :  { %v215_v0 = vshrl.u32 %v214_v62, 30 }
  0x43   :  { %v503_v63 = vmin.u32 %v115_v61, %v113_v59  ;;  %v143_v53 = vand.u32 3, %v142_v50  ;;  %vm369_vm4 = vcmp.eq.s32.totalorder %v364_v54, 2  ;;  %vm366_vm6 = vcmp.eq.s32.totalorder %v364_v54, 0 }
  0x44   :  { %v216_v2 = vshll.u32 %v215_v0, 30  ;;  %v239_v48 = vsub.s32 4, %v215_v0  ;;  %vm365_vm8 = vcmp.lt.s32.totalorder %v364_v54, 2 }
  0x45   :  { %v117_v1 = vclz %v503_v63  ;;  %vm148_vm3 = vcmp.eq.s32.totalorder %v143_v53, 2  ;;  %vm145_vm5 = vcmp.eq.s32.totalorder %v143_v53, 0  ;;  %vm144_vm7 = vcmp.lt.s32.totalorder %v143_v53, 2 }
  0x46   :  { %v217_v5 = vsub.s32 %v213_v60, %v216_v2  ;;  %v240_v49 = vsel %vm155_vm1, %v239_v48, %v215_v0 }
  0x47   :  { %v504_v3 = vadd.s32 4294967294, %v117_v1  ;;  %v242_v51 = vsel %vm154_vm2, 0, %v240_v49 }
  0x48   :  { %v219_v6 = vsub.s32 0, %v217_v5  ;;  %v246_v56 = vadd.s32 3, %v242_v51  ;;  %v467_v60 = vand.u32 3, %v242_v51 }
  0x49   :  { %vm505_vm13 = vcmp.lt.s32.totalorder %v504_v3, 0 }
  0x4a   :  { %v507_v4 = vmin.u32 %v219_v6, %v217_v5  ;;  %v120_v7 = vsel %vm505_vm13, 0, %v504_v3  ;;  %v247_v55 = vand.u32 3, %v246_v56  ;;  %vm469_vm11 = vcmp.eq.s32.totalorder %v467_v60, 0 }
  0x4b   :  { %v125_v10 = vsub.s32 4294967266, %v120_v7  ;;  %v121_v15 = vsub.s32 32, %v120_v7  ;;  %v122_v19 = vshll.u32 %v113_v59, %v120_v7  ;;  %vm472_vm12 = vcmp.eq.s32.totalorder %v467_v60, 2 }
  0x4c   :  { %v221_v8 = vclz %v507_v4  ;;  %vm249_vm9 = vcmp.eq.s32.totalorder %v247_v55, 0  ;;  %vm252_vm10 = vcmp.eq.s32.totalorder %v247_v55, 2  ;;  %vm141_vm13 = vweird.f32 %v637_v13 }
  0x4d   :  { %v126_v16 = vadd.s32 127, %v125_v10  ;;  %v123_v20 = vshrl.u32 %v105_v12, %v121_v15 }
  0x4e   :  { %v508_v9 = vadd.s32 4294967294, %v221_v8 }
  0x4f   :  { %v127_v23 = vshll.u32 %v126_v16, 23  ;;  %v124_v28 = vor.u32 %v123_v20, %v122_v19 }
  0x50   :  { %vm509_vm14 = vcmp.lt.s32.totalorder %v508_v9, 0 }
  0x51   :  { %v224_v11 = vsel %vm509_vm14, 0, %v508_v9  ;;  %v128_v29 = vor.u32 4788187, %v127_v23  ;;  %v131_v37 = vcvt.s32.f32 %v124_v28  ;;  %vm248_vm14 = vcmp.lt.s32.totalorder %v247_v55, 2 }
  0x52   :  { %v229_v18 = vsub.s32 4294967266, %v224_v11  ;;  %v225_v26 = vsub.s32 32, %v224_v11  ;;  %v226_v30 = vshll.u32 %v217_v5, %v224_v11 }
  0x53   :  { %v129_v35 = vand.u32 2147483647, %v128_v29 }
  0x54   :  { %v230_v27 = vadd.s32 127, %v229_v18  ;;  %v227_v31 = vshrl.u32 %v209_v25, %v225_v26 }
  0x55   :  { %v132_v22 = vmul.f32 %v131_v37, %v129_v35 }
  0x56   :  { %v231_v34 = vshll.u32 %v230_v27, 23  ;;  %v228_v38 = vor.u32 %v227_v31, %v226_v30 }
  0x57   :  { %v133_v32 = vxor.u32 2147483648, %v132_v22 }
  0x58   :  { %v232_v39 = vor.u32 4788187, %v231_v34  ;;  %v235_v42 = vcvt.s32.f32 %v228_v38 }
  0x59   :  { %v134_v41 = vsel %vm51_vm15, %v133_v32, %v132_v22  ;;  %vm468_vm15 = vcmp.lt.s32.totalorder %v467_v60, 2 }
  0x5a   :  { %v233_v24 = vand.u32 2147483647, %v232_v39  ;;  %v137_v33 = vsel %vm50_vm0, %v637_v13, %v134_v41  ;;  %vm245_vm0 = vweird.f32 %v640_v14 }
  0x5b   :  { %539 = vcosq.f32 %v137_v33 }
  0x5c   :  { %v236_v36 = vmul.f32 %v235_v42, %v233_v24  ;;  %541 = vsinq.f32 %v137_v33 }
  0x5e   :  { %v237_v43 = vxor.u32 2147483648, %v236_v36 }
  0x60   :  { %v238_v44 = vsel %vm155_vm1, %v237_v43, %v236_v36 }
  0x61   :  { %v241_v46 = vsel %vm154_vm2, %v640_v14, %v238_v44 }
  0x62   :  { %543 = vcosq.f32 %v241_v46 }
  0x63   :  { %545 = vsinq.f32 %v241_v46 }
  0x68   :  { %v540_v52 = vpop.eup %539 }
  0x69   :  { %v542_v40 = vpop.eup %541  ;;  %v149_v21 = vxor.u32 2147483648, %v540_v52 }
  0x6a   :  { %v146_v58 = vxor.u32 2147483648, %v542_v40 }
  0x6b   :  { %v150_v61 = vsel %vm148_vm3, %v149_v21, %v542_v40  ;;  %v371_v62 = vsel %vm369_vm4, %v149_v21, %v542_v40 }
  0x6c   :  { %v147_v63 = vsel %vm145_vm5, %v540_v52, %v146_v58  ;;  %v368_v0 = vsel %vm366_vm6, %v540_v52, %v146_v58 }
  0x6d   :  { %v151_v3 = vsel %vm144_vm7, %v147_v63, %v150_v61  ;;  %v372_v5 = vsel %vm365_vm8, %v368_v0, %v371_v62 }
  0x6e   :  { %v152_v9 = vsel %vm141_vm13, nan, %v151_v3  ;;  %v373_v10 = vsel %vm141_vm13, nan, %v372_v5 }
  0x6f   :  { %v544_v57 = vpop.eup %543 }
  0x70   :  { %v546_v59 = vpop.eup %545  ;;  %v253_v2 = vxor.u32 2147483648, %v544_v57 }
  0x71   :  { %v250_v1 = vxor.u32 2147483648, %v546_v59 }
  0x72   :  { %v254_v4 = vsel %vm252_vm10, %v253_v2, %v546_v59  ;;  %v474_v8 = vsel %vm472_vm12, %v253_v2, %v546_v59 }
  0x73   :  { %v251_v6 = vsel %vm249_vm9, %v544_v57, %v250_v1  ;;  %v471_v7 = vsel %vm469_vm11, %v544_v57, %v250_v1 }
  0x74   :  { %v255_v11 = vsel %vm248_vm14, %v251_v6, %v254_v4  ;;  %v475_v12 = vsel %vm468_vm15, %v471_v7, %v474_v8 }
  0x75   :  { %v256_v13 = vsel %vm245_vm0, nan, %v255_v11  ;;  %v476_v19 = vsel %vm245_vm0, nan, %v475_v12 }
  0x96   :  { %v260_v15 = vpop.permute.xlu0 %259 }
  0x97   :  { %v267_v16 = vmul.f32 %v260_v15, %v152_v9  ;;  %v477_v18 = vmul.f32 %v373_v10, %v260_v15 }
  0x99   :  { %269 = vst [vmem:[#allocation7] sm:$0xff] %v267_v16  ;;  %479 = vst [vmem:[#allocation7 + $0x10] sm:$0xff] %v477_v18 }
  0x9a   :  { %v265_v20 = vpop.permute.xlu0 %264 }
  0x9b   :  { %v268_v23 = vmul.f32 %v265_v20, %v256_v13  ;;  %v478_v25 = vmul.f32 %v476_v19, %v265_v20 }
  0x9d   :  { %270 = vst [vmem:[#allocation7 + $0x8] sm:$0xff] %v268_v23  ;;  %480 = vst [vmem:[#allocation7 + $0x18] sm:$0xff] %v478_v25 }
  0x9e   :  { %586 = shalt.err (!%p583_p9)
}
  0x9f   :  { %s611_s22 = smov 128   ;;  %s612_s23 = smov 8  }
  0xa0   :  { %493 = dma.vmem_to_hbm [thread:$0]  %s488_s20, 640, %s705_s2, [#allocation6], %s611_s22, %s611_s22, %s612_s23  }
  0xa1   :  { %599 = dma.done.wait [#allocation6], 640  }
  0xa2   :  { %600 = vsyncadd [#allocation6], 4294966656 }
  0xa3   :  { %497 = vsyncpa [#allocation5], 1 }
  0xa4   :  { %498 = vsyncpa [#allocation6], 1 }

</bundles_post_ra>
